<compile_context>
chip_gen: v7x
topology: tpu7x:2x2x1
jax: 0.10.0
libtpu: 0.0.40
codegen_flags: <defaults>
</compile_context>

<pallas_src>
import functools

import jax
import jax.numpy as jnp
from jax.experimental import pallas as pl
from jax.experimental.pallas import tpu as pltpu


def decoder_kernel(z_ref, w1_ref, b1_ref, w2_ref, b2_ref, w3_ref, b3_ref, o_ref):
    # fc1 + ReLU  (MXU: (Bt,32) x (32,128))
    h1 = jnp.dot(z_ref[...], w1_ref[...], preferred_element_type=jnp.float32)
    h1 = jnp.maximum(h1 + b1_ref[...], 0.0)
    # fc2 + ReLU  (MXU: (Bt,128) x (128,512)); dropout == identity in eval mode
    h2 = jnp.dot(h1, w2_ref[...], preferred_element_type=jnp.float32)
    h2 = jnp.maximum(h2 + b2_ref[...], 0.0)
    # out: future_steps == 1, so use a VPU multiply against the lane-dense w3
    # row and an XLU lane reduction instead of a (512, 1) MXU matmul.
    # b3 is an SMEM scalar.
    o = jnp.sum(h2 * w3_ref[...], axis=-1, keepdims=True) + b3_ref[0, 0]
    o_ref[...] = o.astype(o_ref.dtype)


def _round_up(x, m):
    return ((x + m - 1) // m) * m


def prepare_decoder_params(params):
    """One-time layout prep: pad hidden 500 -> 512 with zeros, transpose w3 to a
    lane-dense row, reshape b3 to an SMEM-friendly (1, 1) scalar."""
    w1, b1, w2, b2, w3, b3 = params
    hidden = w2.shape[1]
    hidden_pad = _round_up(hidden, 128)
    if hidden_pad != hidden:
        pad = hidden_pad - hidden
        w2 = jnp.pad(w2, ((0, 0), (0, pad)))
        b2 = jnp.pad(b2, ((0, 0), (0, pad)))
        w3 = jnp.pad(w3, ((0, pad), (0, 0)))
    w3_row = w3.T                    # (future_steps, hidden_pad) lane-dense row
    b3 = b3.reshape(1, 1)
    return (w1, b1, w2, b2, w3_row, b3)


@functools.partial(jax.jit, static_argnames=("block_b",))
def decoder_forward(z, prepared_params, *, block_b=None):
    w1, b1, w2, b2, w3_row, b3 = prepared_params
    B, latent_dim = z.shape
    hidden1 = w1.shape[1]            # 128
    hidden_pad = w2.shape[1]         # 512
    future_steps = w3_row.shape[0]   # 1 (VPU-reduce path is specialized for N=1)
    assert future_steps == 1, "final-layer VPU-reduce path assumes future_steps == 1"

    # Batch tiling: multiple of 8 sublanes, cap at 128 rows per block.
    if block_b is None:
        block_b = min(128, _round_up(B, 8))
    B_pad = _round_up(B, block_b)
    if B_pad != B:
        z = jnp.pad(z, ((0, B_pad - B), (0, 0)))

    out = pl.pallas_call(
        decoder_kernel,
        out_shape=jax.ShapeDtypeStruct((B_pad, future_steps), jnp.float32),
        grid=(B_pad // block_b,),
        in_specs=[
            pl.BlockSpec((block_b, latent_dim), lambda i: (i, 0)),
            pl.BlockSpec((latent_dim, hidden1), lambda i: (0, 0)),
            pl.BlockSpec((1, hidden1), lambda i: (0, 0)),
            pl.BlockSpec((hidden1, hidden_pad), lambda i: (0, 0)),
            pl.BlockSpec((1, hidden_pad), lambda i: (0, 0)),
            pl.BlockSpec((1, hidden_pad), lambda i: (0, 0)),
            pl.BlockSpec(memory_space=pltpu.MemorySpace.SMEM),   # b3 scalar
        ],
        out_specs=pl.BlockSpec((block_b, future_steps), lambda i: (i, 0)),
        compiler_params=pltpu.CompilerParams(
            dimension_semantics=("parallel",)),
    )(z, w1, b1, w2, b2, w3_row, b3)

    return out[:B] if B_pad != B else out


def init_params(key, latent_dim=32, future_steps=1):
    """Deterministic init mimicking nn.Linear's U(-1/sqrt(fan_in), 1/sqrt(fan_in))."""
    def linear(key, fan_in, fan_out):
        kw, kb = jax.random.split(key)
        bound = 1.0 / jnp.sqrt(fan_in)
        w = jax.random.uniform(kw, (fan_in, fan_out), jnp.float32, -bound, bound)
        b = jax.random.uniform(kb, (1, fan_out), jnp.float32, -bound, bound)
        return w, b

    k1, k2, k3 = jax.random.split(key, 3)
    w1, b1 = linear(k1, latent_dim, 128)
    w2, b2 = linear(k2, 128, 500)
    w3, b3 = linear(k3, 500, future_steps)
    return (w1, b1, w2, b2, w3, b3)


def decoder_reference(z, params):
    w1, b1, w2, b2, w3, b3 = params
    h1 = jnp.maximum(z @ w1 + b1, 0.0)
    h2 = jnp.maximum(h1 @ w2 + b2, 0.0)
    return h2 @ w3 + b3


if __name__ == "__main__":
    latent_dim = 32
    future_steps = 1
    batch = 8

    key = jax.random.PRNGKey(0)
    k_z, k_p = jax.random.split(key)
    z = jax.random.normal(k_z, (batch, latent_dim), dtype=jnp.float32)
    params = init_params(k_p, latent_dim, future_steps)

    prepared = prepare_decoder_params(params)   # one-time padding / layout prep
    out = decoder_forward(z, prepared)
    out = jax.block_until_ready(out)

    ref = decoder_reference(z, params)
    assert out.shape == (batch, future_steps)
    assert jnp.allclose(out, ref, atol=1e-4, rtol=1e-4)

    print("KERNEL_OK")
</pallas_src>

<mosaic_0001>
module attributes {stable_mosaic.version = 11 : i64} {
  func.func @decoder_kernel(%arg0: i32, %arg1: memref<8x32xf32, #tpu.memory_space<vmem>>, %arg2: memref<32x128xf32, #tpu.memory_space<vmem>>, %arg3: memref<1x128xf32, #tpu.memory_space<vmem>>, %arg4: memref<128x512xf32, #tpu.memory_space<vmem>>, %arg5: memref<1x512xf32, #tpu.memory_space<vmem>>, %arg6: memref<1x512xf32, #tpu.memory_space<vmem>>, %arg7: memref<1x1xf32, #tpu.memory_space<smem>>, %arg8: memref<8x1xf32, #tpu.memory_space<vmem>>) attributes {dimension_semantics = [#tpu.dimension_semantics<parallel>], iteration_bounds = array<i64: 1>, scalar_prefetch = 0 : i64, scratch_operands = 0 : i64, tpu.core_type = #tpu.core_type<tc>, window_params = [{transform_indices = @transform_0, window_bounds = array<i64: 8, 32>}, {pipeline_mode = #tpu.pipeline_mode<synchronous>, transform_indices = @transform_1, window_bounds = array<i64: 32, 128>}, {pipeline_mode = #tpu.pipeline_mode<synchronous>, transform_indices = @transform_2, window_bounds = array<i64: 1, 128>}, {pipeline_mode = #tpu.pipeline_mode<synchronous>, transform_indices = @transform_3, window_bounds = array<i64: 128, 512>}, {pipeline_mode = #tpu.pipeline_mode<synchronous>, transform_indices = @transform_4, window_bounds = array<i64: 1, 512>}, {pipeline_mode = #tpu.pipeline_mode<synchronous>, transform_indices = @transform_5, window_bounds = array<i64: 1, 512>}, {transform_indices = @transform_6, window_bounds = array<i64: 1, 1>}, {transform_indices = @transform_7, window_bounds = array<i64: 8, 1>}]} {
    %c0 = arith.constant 0 : index
    %c0_0 = arith.constant 0 : index
    %0 = vector.load %arg1[%c0, %c0_0] : memref<8x32xf32, #tpu.memory_space<vmem>>, vector<8x32xf32>
    %c0_1 = arith.constant 0 : index
    %c0_2 = arith.constant 0 : index
    %1 = vector.load %arg2[%c0_1, %c0_2] : memref<32x128xf32, #tpu.memory_space<vmem>>, vector<32x128xf32>
    %cst = arith.constant dense<0.000000e+00> : vector<8x128xf32>
    %2 = tpu.matmul %0, %1, %cst {dimension_numbers = #tpu.dot_dimension_numbers<[1], [0], [0], [1], [0, 0, 1, 1], [], []>} : vector<8x32xf32>, vector<32x128xf32>, vector<8x128xf32> -> vector<8x128xf32>
    %c0_3 = arith.constant 0 : index
    %c0_4 = arith.constant 0 : index
    %3 = vector.load %arg3[%c0_3, %c0_4] : memref<1x128xf32, #tpu.memory_space<vmem>>, vector<1x128xf32>
    %4 = vector.broadcast %3 : vector<1x128xf32> to vector<8x128xf32>
    %5 = arith.addf %2, %4 : vector<8x128xf32>
    %cst_5 = arith.constant 0.000000e+00 : f32
    %6 = vector.broadcast %cst_5 : f32 to vector<8x128xf32>
    %7 = arith.maximumf %5, %6 : vector<8x128xf32>
    %c0_6 = arith.constant 0 : index
    %c0_7 = arith.constant 0 : index
    %8 = vector.load %arg4[%c0_6, %c0_7] : memref<128x512xf32, #tpu.memory_space<vmem>>, vector<128x512xf32>
    %cst_8 = arith.constant dense<0.000000e+00> : vector<8x512xf32>
    %9 = tpu.matmul %7, %8, %cst_8 {dimension_numbers = #tpu.dot_dimension_numbers<[1], [0], [0], [1], [0, 0, 1, 1], [], []>} : vector<8x128xf32>, vector<128x512xf32>, vector<8x512xf32> -> vector<8x512xf32>
    %c0_9 = arith.constant 0 : index
    %c0_10 = arith.constant 0 : index
    %10 = vector.load %arg5[%c0_9, %c0_10] : memref<1x512xf32, #tpu.memory_space<vmem>>, vector<1x512xf32>
    %11 = vector.broadcast %10 : vector<1x512xf32> to vector<8x512xf32>
    %12 = arith.addf %9, %11 : vector<8x512xf32>
    %cst_11 = arith.constant 0.000000e+00 : f32
    %13 = vector.broadcast %cst_11 : f32 to vector<8x512xf32>
    %14 = arith.maximumf %12, %13 : vector<8x512xf32>
    %c0_12 = arith.constant 0 : index
    %c0_13 = arith.constant 0 : index
    %15 = vector.load %arg6[%c0_12, %c0_13] : memref<1x512xf32, #tpu.memory_space<vmem>>, vector<1x512xf32>
    %16 = vector.broadcast %15 : vector<1x512xf32> to vector<8x512xf32>
    %17 = arith.mulf %14, %16 : vector<8x512xf32>
    %cst_14 = arith.constant dense<0.000000e+00> : vector<8xf32>
    %18 = vector.multi_reduction <add>, %17, %cst_14 [1] : vector<8x512xf32> to vector<8xf32>
    %19 = vector.shape_cast %18 : vector<8xf32> to vector<8x1xf32>
    %c0_15 = arith.constant 0 : index
    %c0_16 = arith.constant 0 : index
    %20 = memref.load %arg7[%c0_15, %c0_16] : memref<1x1xf32, #tpu.memory_space<smem>>
    %21 = vector.broadcast %20 : f32 to vector<8x1xf32>
    %22 = arith.addf %19, %21 : vector<8x1xf32>
    %c0_17 = arith.constant 0 : index
    %c0_18 = arith.constant 0 : index
    %23 = vector.load %arg8[%c0_17, %c0_18] : memref<8x1xf32, #tpu.memory_space<vmem>>, vector<8x1xf32>
    tpu.vector_store %arg8[%c0_17, %c0_18], %22 {strides = array<i32>} : memref<8x1xf32, #tpu.memory_space<vmem>>, vector<8x1xf32>,
    return
  }
  func.func @transform_0(%arg0: i32) -> (i32, i32) {
    %c0_i32 = arith.constant 0 : i32
    %c0_i32_0 = arith.constant 0 : i32
    return %arg0, %c0_i32 : i32, i32
  }
  func.func @transform_1(%arg0: i32) -> (i32, i32) {
    %c0_i32 = arith.constant 0 : i32
    %c0_i32_0 = arith.constant 0 : i32
    %c0_i32_1 = arith.constant 0 : i32
    return %c0_i32, %c0_i32_0 : i32, i32
  }
  func.func @transform_2(%arg0: i32) -> (i32, i32) {
    %c0_i32 = arith.constant 0 : i32
    %c0_i32_0 = arith.constant 0 : i32
    %c0_i32_1 = arith.constant 0 : i32
    return %c0_i32, %c0_i32_0 : i32, i32
  }
  func.func @transform_3(%arg0: i32) -> (i32, i32) {
    %c0_i32 = arith.constant 0 : i32
    %c0_i32_0 = arith.constant 0 : i32
    %c0_i32_1 = arith.constant 0 : i32
    return %c0_i32, %c0_i32_0 : i32, i32
  }
  func.func @transform_4(%arg0: i32) -> (i32, i32) {
    %c0_i32 = arith.constant 0 : i32
    %c0_i32_0 = arith.constant 0 : i32
    %c0_i32_1 = arith.constant 0 : i32
    return %c0_i32, %c0_i32_0 : i32, i32
  }
  func.func @transform_5(%arg0: i32) -> (i32, i32) {
    %c0_i32 = arith.constant 0 : i32
    %c0_i32_0 = arith.constant 0 : i32
    %c0_i32_1 = arith.constant 0 : i32
    return %c0_i32, %c0_i32_0 : i32, i32
  }
  func.func @transform_6(%arg0: i32) -> (i32, i32) {
    %c0_i32 = arith.constant 0 : i32
    %c0_i32_0 = arith.constant 0 : i32
    %c0_i32_1 = arith.constant 0 : i32
    return %c0_i32, %c0_i32_0 : i32, i32
  }
  func.func @transform_7(%arg0: i32) -> (i32, i32) {
    %c0_i32 = arith.constant 0 : i32
    %c0_i32_0 = arith.constant 0 : i32
    return %arg0, %c0_i32 : i32, i32
  }
}

</mosaic_0001>

<bundles_post_ra>
// kernel: decoder_forward.1
= control target key start
LH: loop header
LB: loop body
LE: loop exit
PB: predicated region body
PF: predicated region fallthrough
CT: control target
= control target key end

     0   :  { %13 = vsyncpa [#allocation4], 0  ;;  %s700_s0 = inlined_call_operand.hbm [shape: f32[8,32], index: 0, kind: input, shape index: {}]   ;;  %s701_s1 = inlined_call_operand.hbm [shape: f32[32,128], index: 1, kind: input, shape index: {}]   ;;  %s702_s2 = inlined_call_operand.vmem [shape: f32[1,128], index: 2, kind: input, shape index: {}]   ;;  %s703_s3 = inlined_call_operand.hbm [shape: f32[128,512], index: 3, kind: input, shape index: {}]   ;;  %s704_s4 = inlined_call_operand.vmem [shape: f32[1,512], index: 4, kind: input, shape index: {}]   ;;  %s705_s5 = inlined_call_operand.vmem [shape: f32[1,512], index: 5, kind: input, shape index: {}]   ;;  %s706_s6 = inlined_call_operand.<no memory space> [shape: f32[1,1], index: 6, kind: input, shape index: {}]   ;;  %s707_s7 = inlined_call_operand.vmem [shape: f32[8,1], index: 7, kind: output, shape index: {}]  }
   0x1   :  { %14 = vsyncpa [#allocation6], 0  ;;  %s595_s24 = smov [#allocation5]   ;;  %s525_s28 = scalar_lea.hbm %s701_s1, 512 }
   0x2   :  { %s30_s25 = sshll.u32 %s595_s24, 4  ;;  %p526_p0 = scmp.ne.s32.totalorder %s701_s1, %s525_s28  ;;  %s31_s25 = int_to_ptr.vmem [resolvable:$true] %s30_s25 }
   0x3   :  { %p529_p1 = scmp.lt.u32.totalorder %s525_s28, %s701_s1 }
   0x5   :  { %p531_p2 = pnand %p529_p1, %p526_p0 }
   0x7   :  { %534 = shalt.err (!%p531_p2)
}
   0x8   :  { %s535_s10 = scalar_lea.vmem %s31_s25, 512  ;;  %p540_p4 = scmp.lt.s32.totalorder %s31_s25, %s31_s25 }
   0x9   :  { %p536_p3 = scmp.ne.s32.totalorder %s31_s25, %s535_s10  ;;  %p541_p5 = scmp.lt.s32.totalorder %s535_s10, %s535_s10 }
   0xb   :  { %p542_p6 = por %p541_p5, %p540_p4 }
   0xd   :  { %p543_p7 = pnand %p542_p6, %p536_p3 }
   0xf   :  { %546 = shalt.err (!%p543_p7)
}
  0x10   :  { %s596_s11 = smov 128   ;;  %s597_s12 = smov 8  }
  0x11   :  { %36 = dma.hbm_to_vmem [thread:$0]  %s701_s1, 512, %s31_s25, [#allocation6], %s596_s11, %s596_s11, %s597_s12  }
  0x12   :  { %s598_s15 = smov [#allocation3]   ;;  %s599_s17 = smov [#allocation7]  }
  0x13   :  { %s21_s16 = sshll.u32 %s598_s15, 4  ;;  %s44_s18 = sshll.u32 %s599_s17, 4  ;;  %s22_s16 = int_to_ptr.vmem [resolvable:$true] %s21_s16  ;;  %s45_s18 = int_to_ptr.vmem [resolvable:$true] %s44_s18 }
  0x14   :  { %s547_s21 = scalar_lea.hbm %s700_s0, 128 }
  0x15   :  { %p548_p8 = scmp.ne.s32.totalorder %s700_s0, %s547_s21  ;;  %p551_p9 = scmp.lt.u32.totalorder %s547_s21, %s700_s0 }
  0x17   :  { %p553_p10 = pnand %p551_p9, %p548_p8 }
  0x19   :  { %556 = shalt.err (!%p553_p10)
}
  0x1a   :  { %s557_s1 = scalar_lea.vmem %s22_s16, 128  ;;  %p562_p12 = scmp.lt.s32.totalorder %s22_s16, %s22_s16 }
  0x1b   :  { %p558_p11 = scmp.ne.s32.totalorder %s22_s16, %s557_s1  ;;  %p563_p13 = scmp.lt.s32.totalorder %s557_s1, %s557_s1 }
  0x1d   :  { %p564_p0 = por %p563_p13, %p562_p12 }
  0x1f   :  { %p565_p1 = pnand %p564_p0, %p558_p11 }
  0x21   :  { %568 = shalt.err (!%p565_p1)
}
  0x22   :  { %24 = dma.hbm_to_vmem [thread:$0]  %s700_s0, 128, %s22_s16, [#allocation4]  }
  0x23   :  { %s569_s30 = scalar_lea.hbm %s703_s3, 8192 }
  0x24   :  { %p570_p2 = scmp.ne.s32.totalorder %s703_s3, %s569_s30  ;;  %p573_p3 = scmp.lt.u32.totalorder %s569_s30, %s703_s3 }
  0x26   :  { %p575_p4 = pnand %p573_p3, %p570_p2 }
  0x28   :  { %578 = shalt.err (!%p575_p4)
}
  0x29   :  { %s579_s12 = scalar_lea.vmem %s45_s18, 8192  ;;  %p584_p6 = scmp.lt.s32.totalorder %s45_s18, %s45_s18 }
  0x2a   :  { %p580_p5 = scmp.ne.s32.totalorder %s45_s18, %s579_s12  ;;  %p585_p7 = scmp.lt.s32.totalorder %s579_s12, %s579_s12 }
  0x2c   :  { %p586_p8 = por %p585_p7, %p584_p6 }
  0x2e   :  { %p587_p9 = pnand %p586_p8, %p580_p5 }
  0x30   :  { %590 = shalt.err (!%p587_p9)
}
  0x31   :  { %s600_s0 = smov 512   ;;  %s601_s13 = smov 32  }
  0x32   :  { %50 = dma.hbm_to_vmem [thread:$0]  %s703_s3, 8192, %s45_s18, [#allocation6], %s600_s0, %s600_s0, %s601_s13  }
  0x33   :  { %591 = dma.done.wait [#allocation4], 128  }
  0x34   :  { %592 = vsyncadd [#allocation4], 4294967168 }
  0x35   :  { %593 = dma.done.wait [#allocation6], 8704  }
  0x36   :  { %594 = vsyncadd [#allocation6], 4294958592  ;;  %v602_v0 = vmov 0.0|0.0   ;;  %vm603_vm0 = vmmov 0   ;;  %v604_v1 = vmov 0.0   ;;  %v67_v2 = vld [vmem:[#allocation5] sm:$0xff] }
  0x37   :  { %445 = vmatprep.subr.bf16.mxu0 %v602_v0  ;;  %442 = vmatprep.mubr.msk.f32.mxu0 %vm603_vm0, %v604_v1  ;;  %v68_v3 = vld [vmem:[#allocation5 + $0x8] sm:$0xff]  ;;  %v69_v4 = vld [vmem:[#allocation5 + $0x10] sm:$0xff]  ;;  %v70_v6 = vld [vmem:[#allocation5 + $0x18] sm:$0xff]  ;;  %vm78_vm1 = vcmask 261120   ;;  %vm419_vm2 = vcmask 7168  }
  0x38   :  { %303 = vmatprep.mubr.f32.mxu1 %v604_v1  ;;  %v446_v5 = vpack.c.bf16 %v68_v3, %v67_v2  ;;  %v154_v7 = vld [vmem:[#allocation7 + $0x8] sm:$0xff]  ;;  %v156_v9 = vld [vmem:[#allocation7 + $0x18] sm:$0xff]  ;;  %v449_v11 = vpack.c.bf16 %v70_v6, %v69_v4  ;;  %v153_v13 = vld [vmem:[#allocation7] sm:$0xff] }
  0x39   :  { %v158_v8 = vld [vmem:[#allocation7 + $0x28] sm:$0xff]  ;;  %v160_v10 = vld [vmem:[#allocation7 + $0x38] sm:$0xff]  ;;  %v157_v14 = vld [vmem:[#allocation7 + $0x20] sm:$0xff] }
  0x3a   :  { %447 = vmatpush3.bf16.msra.mxu0 %v446_v5  ;;  %v451_v12 = vpack.c.bf16 %v158_v8, %v154_v7  ;;  %v155_v15 = vld [vmem:[#allocation7 + $0x10] sm:$0xff]  ;;  %v483_v16 = vpack.c.bf16 %v160_v10, %v156_v9  ;;  %v453_v17 = vpack.c.bf16 %v157_v14, %v153_v13  ;;  %v162_v19 = vld [vmem:[#allocation7 + $0x48] sm:$0xff]  ;;  %v164_v22 = vld [vmem:[#allocation7 + $0x58] sm:$0xff] }
  0x3b   :  { %448 = vmatprep.subr.bf16.mxu0 %v602_v0  ;;  %v159_v18 = vld [vmem:[#allocation7 + $0x30] sm:$0xff]  ;;  %v166_v20 = vld [vmem:[#allocation7 + $0x68] sm:$0xff]  ;;  %v168_v23 = vld [vmem:[#allocation7 + $0x78] sm:$0xff] }
  0x3c   :  { %452 = vmatprep.subr.bf16.mxu1 %v451_v12  ;;  %v455_v21 = vpack.c.bf16 %v166_v20, %v162_v19  ;;  %v161_v24 = vld [vmem:[#allocation7 + $0x40] sm:$0xff]  ;;  %v66_v25 = vld [vmem:[#allocation3] sm:$0xff]  ;;  %v485_v27 = vpack.c.bf16 %v159_v18, %v155_v15  ;;  %v163_v29 = vld [vmem:[#allocation7 + $0x50] sm:$0xff]  ;;  %v487_v32 = vpack.c.bf16 %v168_v23, %v164_v22 }
  0x3d   :  { %454 = vmatpush1.bf16.msra.mxu1 %v453_v17  ;;  %v165_v26 = vld [vmem:[#allocation7 + $0x60] sm:$0xff]  ;;  %v170_v30 = vld [vmem:[#allocation7 + $0x88] sm:$0xff]  ;;  %v167_v33 = vld [vmem:[#allocation7 + $0x70] sm:$0xff] }
  0x3e   :  { %450 = vmatpush3.bf16.msra.mxu0 %v449_v11  ;;  %456 = vmatprep.subr.bf16.mxu1 %v455_v21  ;;  %v457_v28 = vpack.c.bf16 %v165_v26, %v161_v24  ;;  %v174_v31 = vld [vmem:[#allocation7 + $0xa8] sm:$0xff]  ;;  %v169_v35 = vld [vmem:[#allocation7 + $0x80] sm:$0xff]  ;;  %v172_v37 = vld [vmem:[#allocation7 + $0x98] sm:$0xff]  ;;  %v489_v42 = vpack.c.bf16 %v167_v33, %v163_v29 }
  0x3f   :  { %484 = vmatprep.subr.bf16.mxu0 %v483_v16  ;;  %v459_v34 = vpack.c.bf16 %v174_v31, %v170_v30  ;;  %v173_v36 = vld [vmem:[#allocation7 + $0xa0] sm:$0xff]  ;;  %v176_v38 = vld [vmem:[#allocation7 + $0xb8] sm:$0xff]  ;;  %v178_v39 = vld [vmem:[#allocation7 + $0xc8] sm:$0xff] }
  0x40   :  { %v461_v40 = vpack.c.bf16 %v173_v36, %v169_v35  ;;  %v182_v41 = vld [vmem:[#allocation7 + $0xe8] sm:$0xff]  ;;  %v171_v43 = vld [vmem:[#allocation7 + $0x90] sm:$0xff]  ;;  %v177_v45 = vld [vmem:[#allocation7 + $0xc0] sm:$0xff]  ;;  %v491_v47 = vpack.c.bf16 %v176_v38, %v172_v37 }
  0x41   :  { %443 = vmatmul.mubr.msk.f32.vlgmr.msra.gmra.mrb[0].mxu0 %vm78_vm1, %v66_v25  ;;  %458 = vmatpush1.bf16.msra.mxu1 %v457_v28  ;;  %v463_v44 = vpack.c.bf16 %v182_v41, %v178_v39  ;;  %v181_v46 = vld [vmem:[#allocation7 + $0xe0] sm:$0xff]  ;;  %v175_v48 = vld [vmem:[#allocation7 + $0xb0] sm:$0xff]  ;;  %v186_v49 = vld [vmem:[#allocation7 + $0x108] sm:$0xff] }
  0x42   :  { %486 = vmatpush1.bf16.msra.mxu0 %v485_v27  ;;  %460 = vmatprep.subr.bf16.mxu1 %v459_v34  ;;  %v190_v50 = vld [vmem:[#allocation7 + $0x128] sm:$0xff]  ;;  %v180_v51 = vld [vmem:[#allocation7 + $0xd8] sm:$0xff]  ;;  %v465_v53 = vpack.c.bf16 %v181_v46, %v177_v45  ;;  %v493_v54 = vpack.c.bf16 %v175_v48, %v171_v43  ;;  %v179_v55 = vld [vmem:[#allocation7 + $0xd0] sm:$0xff]  ;;  %v219_v46 = vlaneseq }
  0x43   :  { %488 = vmatprep.subr.bf16.mxu0 %v487_v32  ;;  %374 = vmatprep.mubr.f32.mxu0 %v604_v1  ;;  %v184_v52 = vld [vmem:[#allocation7 + $0xf8] sm:$0xff]  ;;  %v467_v56 = vpack.c.bf16 %v190_v50, %v186_v49  ;;  %v185_v57 = vld [vmem:[#allocation7 + $0x100] sm:$0xff]  ;;  %v183_v60 = vld [vmem:[#allocation7 + $0xf0] sm:$0xff] }
  0x44   :  { %v189_v58 = vld [vmem:[#allocation7 + $0x120] sm:$0xff]  ;;  %v495_v59 = vpack.c.bf16 %v184_v52, %v180_v51  ;;  %v194_v61 = vld [vmem:[#allocation7 + $0x148] sm:$0xff]  ;;  %v188_v63 = vld [vmem:[#allocation7 + $0x118] sm:$0xff]  ;;  %v497_v2 = vpack.c.bf16 %v183_v60, %v179_v55 }
  0x45   :  { %462 = vmatpush1.bf16.msra.mxu1 %v461_v40  ;;  %v198_v62 = vld [vmem:[#allocation7 + $0x168] sm:$0xff]  ;;  %v192_v0 = vld [vmem:[#allocation7 + $0x138] sm:$0xff]  ;;  %v469_v1 = vpack.c.bf16 %v189_v58, %v185_v57  ;;  %v187_v3 = vld [vmem:[#allocation7 + $0x110] sm:$0xff] }
  0x46   :  { %490 = vmatpush1.bf16.msra.mxu0 %v489_v42  ;;  %464 = vmatprep.subr.bf16.mxu1 %v463_v44  ;;  %v471_v4 = vpack.c.bf16 %v198_v62, %v194_v61  ;;  %v193_v5 = vld [vmem:[#allocation7 + $0x140] sm:$0xff]  ;;  %v499_v7 = vpack.c.bf16 %v192_v0, %v188_v63  ;;  %v191_v8 = vld [vmem:[#allocation7 + $0x130] sm:$0xff]  ;;  %v202_v9 = vld [vmem:[#allocation7 + $0x188] sm:$0xff] }
  0x47   :  { %492 = vmatprep.subr.bf16.mxu0 %v491_v47  ;;  %v197_v6 = vld [vmem:[#allocation7 + $0x160] sm:$0xff]  ;;  %v206_v10 = vld [vmem:[#allocation7 + $0x1a8] sm:$0xff]  ;;  %v196_v11 = vld [vmem:[#allocation7 + $0x158] sm:$0xff]  ;;  %v501_v14 = vpack.c.bf16 %v191_v8, %v187_v3  ;;  %v220_v47 = vshrl.u32 %v219_v46, 7 }
  0x48   :  { %v200_v12 = vld [vmem:[#allocation7 + $0x178] sm:$0xff]  ;;  %v473_v13 = vpack.c.bf16 %v197_v6, %v193_v5  ;;  %v475_v15 = vpack.c.bf16 %v206_v10, %v202_v9  ;;  %v201_v16 = vld [vmem:[#allocation7 + $0x180] sm:$0xff]  ;;  %v195_v19 = vld [vmem:[#allocation7 + $0x150] sm:$0xff] }
  0x49   :  { %466 = vmatpush1.bf16.msra.mxu1 %v465_v53  ;;  %v205_v17 = vld [vmem:[#allocation7 + $0x1a0] sm:$0xff]  ;;  %v503_v18 = vpack.c.bf16 %v200_v12, %v196_v11  ;;  %v199_v20 = vld [vmem:[#allocation7 + $0x170] sm:$0xff]  ;;  %v204_v21 = vld [vmem:[#allocation7 + $0x198] sm:$0xff]  ;;  %v221_v48 = vsub.s32 0, %v220_v47  ;;  %v229_v49 = vsub.s32 2, %v220_v47  ;;  %v225_v51 = vsub.s32 1, %v220_v47 }
  0x4a   :  { %494 = vmatpush1.bf16.msra.mxu0 %v493_v54  ;;  %468 = vmatprep.subr.bf16.mxu1 %v467_v56  ;;  %v208_v22 = vld [vmem:[#allocation7 + $0x1b8] sm:$0xff]  ;;  %v477_v23 = vpack.c.bf16 %v205_v17, %v201_v16  ;;  %v505_v24 = vpack.c.bf16 %v199_v20, %v195_v19  ;;  %v203_v26 = vld [vmem:[#allocation7 + $0x190] sm:$0xff]  ;;  %v210_v29 = vld [vmem:[#allocation7 + $0x1c8] sm:$0xff]  ;;  %v233_v52 = vsub.s32 3, %v220_v47  ;;  %v417_v17 = vstv %s706_s6 }
  0x4b   :  { %496 = vmatprep.subr.bf16.mxu0 %v495_v59  ;;  %v507_v25 = vpack.c.bf16 %v208_v22, %v204_v21  ;;  %v207_v27 = vld [vmem:[#allocation7 + $0x1b0] sm:$0xff]  ;;  %v214_v30 = vld [vmem:[#allocation7 + $0x1e8] sm:$0xff]  ;;  %v212_v31 = vld [vmem:[#allocation7 + $0x1d8] sm:$0xff] }
  0x4c   :  { %v509_v28 = vpack.c.bf16 %v207_v27, %v203_v26  ;;  %v479_v32 = vpack.c.bf16 %v214_v30, %v210_v29  ;;  %v216_v33 = vld [vmem:[#allocation7 + $0x1f8] sm:$0xff]  ;;  %v209_v34 = vld [vmem:[#allocation7 + $0x1c0] sm:$0xff]  ;;  %v211_v38 = vld [vmem:[#allocation7 + $0x1d0] sm:$0xff] }
  0x4d   :  { %470 = vmatpush1.bf16.msra.mxu1 %v469_v1  ;;  %v213_v35 = vld [vmem:[#allocation7 + $0x1e0] sm:$0xff]  ;;  %v511_v36 = vpack.c.bf16 %v216_v33, %v212_v31  ;;  %v215_v39 = vld [vmem:[#allocation7 + $0x1f0] sm:$0xff]  ;;  %v427_v41 = vld [vmem:[%s702_s2] ss:$0 sm:$0xff] }
  0x4e   :  { %498 = vmatpush1.bf16.msra.mxu0 %v497_v2  ;;  %472 = vmatprep.subr.bf16.mxu1 %v471_v4  ;;  %v481_v37 = vpack.c.bf16 %v213_v35, %v209_v34  ;;  %v513_v40 = vpack.c.bf16 %v215_v39, %v211_v38  ;;  %v217_v50 = vld [vmem:[%s704_s4] sm:$0xf] }
  0x4f   :  { %500 = vmatprep.subr.bf16.mxu0 %v499_v7  ;;  %v222_v53 = vrot.slane %v217_v50, %v221_v48  ;;  %v230_v54 = vrot.slane %v217_v50, %v229_v49  ;;  %v385_v55 = vld [vmem:[%s705_s5] sm:$0xf]  ;;  %v226_v56 = vrot.slane %v217_v50, %v225_v51  ;;  %v234_v57 = vrot.slane %v217_v50, %v233_v52 }
  0x50   :  { %v390_v61 = vrot.slane %v385_v55, %v221_v48  ;;  %v394_v2 = vrot.slane %v385_v55, %v225_v51  ;;  %v398_v6 = vrot.slane %v385_v55, %v229_v49  ;;  %v402_v11 = vrot.slane %v385_v55, %v233_v52 }
  0x51   :  { %474 = vmatpush1.bf16.msra.mxu1 %v473_v13 }
  0x52   :  { %502 = vmatpush1.bf16.msra.mxu0 %v501_v14  ;;  %476 = vmatprep.subr.bf16.mxu1 %v475_v15 }
  0x53   :  { %504 = vmatprep.subr.bf16.mxu0 %v503_v18 }
  0x55   :  { %478 = vmatpush1.bf16.msra.mxu1 %v477_v23 }
  0x56   :  { %506 = vmatpush1.bf16.msra.mxu0 %v505_v24  ;;  %480 = vmatprep.subr.bf16.mxu1 %v479_v32 }
  0x57   :  { %508 = vmatprep.subr.bf16.mxu0 %v507_v25 }
  0x59   :  { %482 = vmatpush1.bf16.msra.mxu1 %v481_v37 }
  0x5a   :  { %510 = vmatpush1.bf16.msra.mxu0 %v509_v28 }
  0x5b   :  { %512 = vmatprep.subr.bf16.mxu0 %v511_v36 }
  0x5e   :  { %514 = vmatpush1.bf16.msra.mxu0 %v513_v40 }
 0x114   :  { %v148_v42 = vpop.f32.mrb[0].mxu0 }
 0x115   :  { %v149_v43 = vadd.f32 %v427_v41, %v148_v42  ;;  %v444_v44 = vpop.f32.mrb[1].mxu0 }
 0x117   :  { %v152_v45 = vmax.f32 %v149_v43, 0.0 }
 0x119   :  { %304 = vmatmul.mubr.f32.vlgmr.msra.gmra.mrb[0].mxu1 %v152_v45  ;;  %375 = vmatmul.mubr.f32.vlgmr.msra.gmra.mrb[2].mxu0 %v152_v45 }
 0x1ec   :  { %v305_v58 = vpop.f32.mrb[0].mxu1  ;;  %v376_v59 = vpop.f32.mrb[2].mxu0 }
 0x1ed   :  { %v306_v60 = vadd.f32 %v305_v58, %v222_v53  ;;  %v377_v62 = vadd.f32 %v376_v59, %v230_v54  ;;  %v307_v63 = vpop.f32.mrb[1].mxu1  ;;  %v378_v0 = vpop.f32.mrb[3].mxu0 }
 0x1ee   :  { %v308_v1 = vadd.f32 %v307_v63, %v226_v56  ;;  %v379_v3 = vadd.f32 %v378_v0, %v234_v57 }
 0x1ef   :  { %v381_v4 = vmax.f32 %v306_v60, 0.0  ;;  %v383_v5 = vmax.f32 %v377_v62, 0.0 }
 0x1f0   :  { %v382_v7 = vmax.f32 %v308_v1, 0.0  ;;  %v384_v10 = vmax.f32 %v379_v3, 0.0 }
 0x1f1   :  { %v407_v8 = vmul.f32 %v390_v61, %v381_v4  ;;  %v409_v12 = vmul.f32 %v398_v6, %v383_v5 }
 0x1f2   :  { %v408_v9 = vmul.f32 %v394_v2, %v382_v7  ;;  %v410_v14 = vmul.f32 %v402_v11, %v384_v10 }
 0x1f4   :  { %v411_v13 = vadd.f32 %v408_v9, %v407_v8 }
 0x1f6   :  { %v412_v15 = vadd.f32 %v411_v13, %v409_v12 }
 0x1f8   :  { %v413_v16 = vadd.f32 %v412_v15, %v410_v14 }
 0x1fa   :  { %414 = vadd.xlane.f32.xlu0 %v413_v16 }
 0x287   :  { %v415_v18 = vpop.xlane.xlu0 %414 }
 0x288   :  { %v418_v19 = vadd.f32 %v417_v17, %v415_v18 }
 0x28a   :  { %420 = vst.msk [vmem:[%s707_s7] sm:$0xff] %vm419_vm2, %v418_v19 }
 0x28b   :  { %425 = vsyncpa [#allocation4], 1 }
 0x28c   :  { %426 = vsyncpa [#allocation6], 1 }

</bundles_post_ra>
